<compile_context>
chip_gen: v5e
topology: v5e:2x2
jax: 0.10.0
libtpu: 0.0.40
codegen_flags: <defaults>
</compile_context>

<pallas_src>
import functools

import jax
import jax.numpy as jnp
from jax.experimental import pallas as pl
from jax.experimental.pallas import tpu as pltpu

# ----------------------------- model dimensions -----------------------------
B, S, H, V = 2, 16, 32, 64   # batch, seq (soft + text tokens), hidden, vocab
P = 4                        # soft-prompt tokens per template
BS = B * S                   # flattened activation rows
VP = 128                     # lane-dense padded vocab for the logits store


def _full_spec(shape):
    # Block == full array (legal regardless of (8,128) since it matches the dims).
    return pl.BlockSpec(shape, lambda i, _n=len(shape): (0,) * _n)


# ---------------------- fused forward kernel (one launch) --------------------
def _fused_forward_kernel(
    ids_ref, pos_ref, emb_ref,
    si_ref, wi1_ref, bi1_ref, wi2_ref, bi2_ref,      # template_<issue> params
    ss_ref, ws1_ref, bs1_ref, ws2_ref, bs2_ref,      # template_share params
    pw1_ref, pb1_ref, pw2_ref, pb2_ref,              # synthetic PLM params
    out_ref,
):
    f32 = jnp.float32

    # ---- embedding lookup: exact one-hot matmul (BS,V) @ (V,H), fully vector ----
    ids = ids_ref[...]                                                    # (BS,1) i32
    onehot = (ids == jax.lax.broadcasted_iota(jnp.int32, (BS, V), 1)).astype(f32)
    raw = jnp.dot(onehot, emb_ref[...], preferred_element_type=f32)       # (BS,H)

    # ---- both prompt encoders (2-layer MLP on soft prompts), then average ----
    hi = jnp.maximum(
        jnp.dot(si_ref[...], wi1_ref[...], preferred_element_type=f32) + bi1_ref[...], 0.0)
    soft_i = jnp.dot(hi, wi2_ref[...], preferred_element_type=f32) + bi2_ref[...]
    hs = jnp.maximum(
        jnp.dot(ss_ref[...], ws1_ref[...], preferred_element_type=f32) + bs1_ref[...], 0.0)
    soft_s = jnp.dot(hs, ws2_ref[...], preferred_element_type=f32) + bs2_ref[...]
    soft_avg = (soft_i + soft_s) * 0.5                                    # (P,H)

    # ---- averaged inputs_embeds ----
    # (issue+share)/2 == raw for text rows (identical embeddings in both
    # templates); == soft_avg[pos] for the first P rows of each sequence.
    pos = pos_ref[...]                                                    # (BS,1) i32
    sel = (pos == jax.lax.broadcasted_iota(jnp.int32, (BS, P), 1)).astype(f32)
    soft_rows = jnp.dot(sel, soft_avg, preferred_element_type=f32)        # (BS,H)
    # sel rows are all-zero for text positions -> soft_rows is exactly 0 there,
    # so an arithmetic blend is exact (no select / bool-broadcast needed).
    is_text = (pos >= P).astype(f32)                                      # (BS,1)
    act = soft_rows + raw * is_text                                       # (BS,H)

    # ---- synthetic PLM head: relu(act @ W1 + b1) @ W2p + b2p  (128-lane store) ----
    h = jnp.maximum(
        jnp.dot(act, pw1_ref[...], preferred_element_type=f32) + pb1_ref[...], 0.0)
    out_ref[...] = jnp.dot(h, pw2_ref[...], preferred_element_type=f32) + pb2_ref[...]


def _cost_estimate():
    flops = 2 * (BS * V * H              # embedding one-hot matmul
                 + 2 * 2 * P * H * H     # two prompt MLPs, two layers each
                 + BS * P * H            # soft-row selection matmul
                 + BS * H * H            # PLM layer 1
                 + BS * H * VP)          # PLM head (padded)
    bytes_in = 4 * (2 * BS                               # ids + pos (i32)
                    + V * H                              # embedding table
                    + 2 * (P * H + 2 * H * H + 2 * H)    # two templates
                    + H * H + H + H * VP + VP)           # PLM weights/biases
    bytes_out = 4 * BS * VP
    return pl.CostEstimate(flops=flops, transcendentals=0,
                           bytes_accessed=bytes_in + bytes_out)


def fused_prompt_shared_plm(ids, pos, emb, tpl_issue, tpl_share,
                            plm_w1, plm_b1, plm_w2p, plm_b2p):
    return pl.pallas_call(
        _fused_forward_kernel,
        out_shape=jax.ShapeDtypeStruct((BS, VP), jnp.float32),
        grid_spec=pl.GridSpec(
            grid=(1,),
            in_specs=[
                _full_spec((BS, 1)), _full_spec((BS, 1)), _full_spec((V, H)),
                # template_<issue>
                _full_spec((P, H)), _full_spec((H, H)), _full_spec((1, H)),
                _full_spec((H, H)), _full_spec((1, H)),
                # template_share
                _full_spec((P, H)), _full_spec((H, H)), _full_spec((1, H)),
                _full_spec((H, H)), _full_spec((1, H)),
                # PLM
                _full_spec((H, H)), _full_spec((1, H)),
                _full_spec((H, VP)), _full_spec((1, VP)),
            ],
            out_specs=_full_spec((BS, VP)),
        ),
        compiler_params=pltpu.CompilerParams(vmem_limit_bytes=4 * 1024 * 1024),
        cost_estimate=_cost_estimate(),
    )(ids, pos, emb,
      tpl_issue["soft"], tpl_issue["w1"], tpl_issue["b1"], tpl_issue["w2"], tpl_issue["b2"],
      tpl_share["soft"], tpl_share["w1"], tpl_share["b1"], tpl_share["w2"], tpl_share["b2"],
      plm_w1, plm_b1, plm_w2p, plm_b2p)


# ------------------------------- parameters ----------------------------------
def _init_template_params(key):
    k1, k2, k3 = jax.random.split(key, 3)
    return {
        "soft": 0.02 * jax.random.normal(k1, (P, H), jnp.float32),
        "w1": 0.1 * jax.random.normal(k2, (H, H), jnp.float32),
        "b1": jnp.zeros((1, H), jnp.float32),
        "w2": 0.1 * jax.random.normal(k3, (H, H), jnp.float32),
        "b2": jnp.zeros((1, H), jnp.float32),
    }


def init_params(key):
    keys = jax.random.split(key, 6)
    w2 = 0.1 * jax.random.normal(keys[4], (H, V), jnp.float32)
    # Pad the LM head to 128 lanes ONCE at init time (zero columns beyond V)
    # so the kernel's output store is unmasked / lane-dense.
    w2p = jnp.zeros((H, VP), jnp.float32).at[:, :V].set(w2)
    return {
        "emb": 0.02 * jax.random.normal(keys[0], (V, H), jnp.float32),
        "templates": {
            "0": _init_template_params(keys[1]),
            "share": _init_template_params(keys[2]),
        },
        "plm_w1": 0.1 * jax.random.normal(keys[3], (H, H), jnp.float32),
        "plm_b1": jnp.zeros((1, H), jnp.float32),
        "plm_w2": w2p,                                   # (H, VP), lane-dense
        "plm_b2": jnp.zeros((1, VP), jnp.float32),
        # static position-within-sequence index for every flattened row
        "pos_ids": jnp.tile(jnp.arange(S, dtype=jnp.int32), B).reshape(BS, 1),
    }


# ----------------------------- forward wrapper --------------------------------
@functools.partial(jax.jit, static_argnames=("issue",))
def prompt_shared_forward(params, input_ids, issue="0"):
    ids = input_ids.reshape(BS, 1).astype(jnp.int32)
    logits_pad = fused_prompt_shared_plm(
        ids, params["pos_ids"], params["emb"],
        params["templates"][issue], params["templates"]["share"],
        params["plm_w1"], params["plm_b1"], params["plm_w2"], params["plm_b2"])
    # template.post_processing_outputs is identity for PtuningTemplate.
    return logits_pad[:, :V].reshape(B, S, V)


# ----------------------- pure-JAX reference (for checking) --------------------
def reference_forward(params, input_ids, issue="0"):
    hp = jax.lax.Precision.HIGHEST
    emb = params["emb"]

    def process_batch(tpl):
        raw = jnp.take(emb, input_ids, axis=0)                              # [B,S,H]
        h = jax.nn.relu(jnp.dot(tpl["soft"], tpl["w1"], precision=hp) + tpl["b1"])
        soft = jnp.dot(h, tpl["w2"], precision=hp) + tpl["b2"]              # [P,H]
        soft_b = jnp.broadcast_to(soft[None], (B, P, H))
        return jnp.concatenate([soft_b, raw[:, P:, :]], axis=1)

    ie = process_batch(params["templates"][issue])
    se = process_batch(params["templates"]["share"])
    x = ((ie + se) * 0.5).reshape(BS, H)
    h = jax.nn.relu(jnp.dot(x, params["plm_w1"], precision=hp) + params["plm_b1"])
    logits = jnp.dot(h, params["plm_w2"], precision=hp) + params["plm_b2"]
    return logits[:, :V].reshape(B, S, V)


if __name__ == "__main__":
    key = jax.random.PRNGKey(0)
    k_params, k_ids = jax.random.split(key)
    params = init_params(k_params)
    input_ids = jax.random.randint(k_ids, (B, S), 0, V, dtype=jnp.int32)

    logits = prompt_shared_forward(params, input_ids, issue="0")
    jax.block_until_ready(logits)
    assert logits.shape == (B, S, V)

    ref = reference_forward(params, input_ids, issue="0")
    max_err = float(jnp.max(jnp.abs(logits - ref)))
    assert jnp.allclose(logits, ref, atol=1e-4, rtol=1e-3), max_err

    print("KERNEL_OK")
</pallas_src>

<mosaic_0001>
module attributes {stable_mosaic.version = 11 : i64} {
  func.func @_fused_forward_kernel(%arg0: i32, %arg1: memref<32x1xi32, #tpu.memory_space<vmem>>, %arg2: memref<32x1xi32, #tpu.memory_space<vmem>>, %arg3: memref<64x32xf32, #tpu.memory_space<vmem>>, %arg4: memref<4x32xf32, #tpu.memory_space<vmem>>, %arg5: memref<32x32xf32, #tpu.memory_space<vmem>>, %arg6: memref<1x32xf32, #tpu.memory_space<vmem>>, %arg7: memref<32x32xf32, #tpu.memory_space<vmem>>, %arg8: memref<1x32xf32, #tpu.memory_space<vmem>>, %arg9: memref<4x32xf32, #tpu.memory_space<vmem>>, %arg10: memref<32x32xf32, #tpu.memory_space<vmem>>, %arg11: memref<1x32xf32, #tpu.memory_space<vmem>>, %arg12: memref<32x32xf32, #tpu.memory_space<vmem>>, %arg13: memref<1x32xf32, #tpu.memory_space<vmem>>, %arg14: memref<32x32xf32, #tpu.memory_space<vmem>>, %arg15: memref<1x32xf32, #tpu.memory_space<vmem>>, %arg16: memref<32x128xf32, #tpu.memory_space<vmem>>, %arg17: memref<1x128xf32, #tpu.memory_space<vmem>>, %arg18: memref<32x128xf32, #tpu.memory_space<vmem>>) attributes {dimension_semantics = [#tpu.dimension_semantics<arbitrary>], iteration_bounds = array<i64: 1>, scalar_prefetch = 0 : i64, scratch_operands = 0 : i64, tpu.core_type = #tpu.core_type<tc>, window_params = [{pipeline_mode = #tpu.pipeline_mode<synchronous>, transform_indices = @transform_0, window_bounds = array<i64: 32, 1>}, {pipeline_mode = #tpu.pipeline_mode<synchronous>, transform_indices = @transform_1, window_bounds = array<i64: 32, 1>}, {pipeline_mode = #tpu.pipeline_mode<synchronous>, transform_indices = @transform_2, window_bounds = array<i64: 64, 32>}, {pipeline_mode = #tpu.pipeline_mode<synchronous>, transform_indices = @transform_3, window_bounds = array<i64: 4, 32>}, {pipeline_mode = #tpu.pipeline_mode<synchronous>, transform_indices = @transform_4, window_bounds = array<i64: 32, 32>}, {pipeline_mode = #tpu.pipeline_mode<synchronous>, transform_indices = @transform_5, window_bounds = array<i64: 1, 32>}, {pipeline_mode = #tpu.pipeline_mode<synchronous>, transform_indices = @transform_6, window_bounds = array<i64: 32, 32>}, {pipeline_mode = #tpu.pipeline_mode<synchronous>, transform_indices = @transform_7, window_bounds = array<i64: 1, 32>}, {pipeline_mode = #tpu.pipeline_mode<synchronous>, transform_indices = @transform_8, window_bounds = array<i64: 4, 32>}, {pipeline_mode = #tpu.pipeline_mode<synchronous>, transform_indices = @transform_9, window_bounds = array<i64: 32, 32>}, {pipeline_mode = #tpu.pipeline_mode<synchronous>, transform_indices = @transform_10, window_bounds = array<i64: 1, 32>}, {pipeline_mode = #tpu.pipeline_mode<synchronous>, transform_indices = @transform_11, window_bounds = array<i64: 32, 32>}, {pipeline_mode = #tpu.pipeline_mode<synchronous>, transform_indices = @transform_12, window_bounds = array<i64: 1, 32>}, {pipeline_mode = #tpu.pipeline_mode<synchronous>, transform_indices = @transform_13, window_bounds = array<i64: 32, 32>}, {pipeline_mode = #tpu.pipeline_mode<synchronous>, transform_indices = @transform_14, window_bounds = array<i64: 1, 32>}, {pipeline_mode = #tpu.pipeline_mode<synchronous>, transform_indices = @transform_15, window_bounds = array<i64: 32, 128>}, {pipeline_mode = #tpu.pipeline_mode<synchronous>, transform_indices = @transform_16, window_bounds = array<i64: 1, 128>}, {pipeline_mode = #tpu.pipeline_mode<synchronous>, transform_indices = @transform_17, window_bounds = array<i64: 32, 128>}]} {
    %c0 = arith.constant 0 : index
    %c0_0 = arith.constant 0 : index
    %0 = vector.load %arg1[%c0, %c0_0] : memref<32x1xi32, #tpu.memory_space<vmem>>, vector<32x1xi32>
    %1 = tpu.iota {dimensions = array<i32: 1>} : vector<32x64xi32>
    %2 = vector.broadcast %0 : vector<32x1xi32> to vector<32x64xi32>
    %3 = arith.cmpi eq, %2, %1 : vector<32x64xi32>
    %4 = arith.extui %3 : vector<32x64xi1> to vector<32x64xi32>
    %5 = arith.sitofp %4 : vector<32x64xi32> to vector<32x64xf32>
    %c0_1 = arith.constant 0 : index
    %c0_2 = arith.constant 0 : index
    %6 = vector.load %arg3[%c0_1, %c0_2] : memref<64x32xf32, #tpu.memory_space<vmem>>, vector<64x32xf32>
    %cst = arith.constant dense<0.000000e+00> : vector<32x32xf32>
    %7 = tpu.matmul %5, %6, %cst {dimension_numbers = #tpu.dot_dimension_numbers<[1], [0], [0], [1], [0, 0, 1, 1], [], []>} : vector<32x64xf32>, vector<64x32xf32>, vector<32x32xf32> -> vector<32x32xf32>
    %c0_3 = arith.constant 0 : index
    %c0_4 = arith.constant 0 : index
    %8 = vector.load %arg4[%c0_3, %c0_4] : memref<4x32xf32, #tpu.memory_space<vmem>>, vector<4x32xf32>
    %c0_5 = arith.constant 0 : index
    %c0_6 = arith.constant 0 : index
    %9 = vector.load %arg5[%c0_5, %c0_6] : memref<32x32xf32, #tpu.memory_space<vmem>>, vector<32x32xf32>
    %cst_7 = arith.constant dense<0.000000e+00> : vector<4x32xf32>
    %10 = tpu.matmul %8, %9, %cst_7 {dimension_numbers = #tpu.dot_dimension_numbers<[1], [0], [0], [1], [0, 0, 1, 1], [], []>} : vector<4x32xf32>, vector<32x32xf32>, vector<4x32xf32> -> vector<4x32xf32>
    %c0_8 = arith.constant 0 : index
    %c0_9 = arith.constant 0 : index
    %11 = vector.load %arg6[%c0_8, %c0_9] : memref<1x32xf32, #tpu.memory_space<vmem>>, vector<1x32xf32>
    %12 = vector.broadcast %11 : vector<1x32xf32> to vector<4x32xf32>
    %13 = arith.addf %10, %12 : vector<4x32xf32>
    %cst_10 = arith.constant 0.000000e+00 : f32
    %14 = vector.broadcast %cst_10 : f32 to vector<4x32xf32>
    %15 = arith.maximumf %13, %14 : vector<4x32xf32>
    %c0_11 = arith.constant 0 : index
    %c0_12 = arith.constant 0 : index
    %16 = vector.load %arg7[%c0_11, %c0_12] : memref<32x32xf32, #tpu.memory_space<vmem>>, vector<32x32xf32>
    %cst_13 = arith.constant dense<0.000000e+00> : vector<4x32xf32>
    %17 = tpu.matmul %15, %16, %cst_13 {dimension_numbers = #tpu.dot_dimension_numbers<[1], [0], [0], [1], [0, 0, 1, 1], [], []>} : vector<4x32xf32>, vector<32x32xf32>, vector<4x32xf32> -> vector<4x32xf32>
    %c0_14 = arith.constant 0 : index
    %c0_15 = arith.constant 0 : index
    %18 = vector.load %arg8[%c0_14, %c0_15] : memref<1x32xf32, #tpu.memory_space<vmem>>, vector<1x32xf32>
    %19 = vector.broadcast %18 : vector<1x32xf32> to vector<4x32xf32>
    %20 = arith.addf %17, %19 : vector<4x32xf32>
    %c0_16 = arith.constant 0 : index
    %c0_17 = arith.constant 0 : index
    %21 = vector.load %arg9[%c0_16, %c0_17] : memref<4x32xf32, #tpu.memory_space<vmem>>, vector<4x32xf32>
    %c0_18 = arith.constant 0 : index
    %c0_19 = arith.constant 0 : index
    %22 = vector.load %arg10[%c0_18, %c0_19] : memref<32x32xf32, #tpu.memory_space<vmem>>, vector<32x32xf32>
    %cst_20 = arith.constant dense<0.000000e+00> : vector<4x32xf32>
    %23 = tpu.matmul %21, %22, %cst_20 {dimension_numbers = #tpu.dot_dimension_numbers<[1], [0], [0], [1], [0, 0, 1, 1], [], []>} : vector<4x32xf32>, vector<32x32xf32>, vector<4x32xf32> -> vector<4x32xf32>
    %c0_21 = arith.constant 0 : index
    %c0_22 = arith.constant 0 : index
    %24 = vector.load %arg11[%c0_21, %c0_22] : memref<1x32xf32, #tpu.memory_space<vmem>>, vector<1x32xf32>
    %25 = vector.broadcast %24 : vector<1x32xf32> to vector<4x32xf32>
    %26 = arith.addf %23, %25 : vector<4x32xf32>
    %cst_23 = arith.constant 0.000000e+00 : f32
    %27 = vector.broadcast %cst_23 : f32 to vector<4x32xf32>
    %28 = arith.maximumf %26, %27 : vector<4x32xf32>
    %c0_24 = arith.constant 0 : index
    %c0_25 = arith.constant 0 : index
    %29 = vector.load %arg12[%c0_24, %c0_25] : memref<32x32xf32, #tpu.memory_space<vmem>>, vector<32x32xf32>
    %cst_26 = arith.constant dense<0.000000e+00> : vector<4x32xf32>
    %30 = tpu.matmul %28, %29, %cst_26 {dimension_numbers = #tpu.dot_dimension_numbers<[1], [0], [0], [1], [0, 0, 1, 1], [], []>} : vector<4x32xf32>, vector<32x32xf32>, vector<4x32xf32> -> vector<4x32xf32>
    %c0_27 = arith.constant 0 : index
    %c0_28 = arith.constant 0 : index
    %31 = vector.load %arg13[%c0_27, %c0_28] : memref<1x32xf32, #tpu.memory_space<vmem>>, vector<1x32xf32>
    %32 = vector.broadcast %31 : vector<1x32xf32> to vector<4x32xf32>
    %33 = arith.addf %30, %32 : vector<4x32xf32>
    %34 = arith.addf %20, %33 : vector<4x32xf32>
    %cst_29 = arith.constant 5.000000e-01 : f32
    %35 = vector.broadcast %cst_29 : f32 to vector<4x32xf32>
    %36 = arith.mulf %34, %35 : vector<4x32xf32>
    %c0_30 = arith.constant 0 : index
    %c0_31 = arith.constant 0 : index
    %37 = vector.load %arg2[%c0_30, %c0_31] : memref<32x1xi32, #tpu.memory_space<vmem>>, vector<32x1xi32>
    %38 = tpu.iota {dimensions = array<i32: 1>} : vector<32x4xi32>
    %39 = vector.broadcast %37 : vector<32x1xi32> to vector<32x4xi32>
    %40 = arith.cmpi eq, %39, %38 : vector<32x4xi32>
    %41 = arith.extui %40 : vector<32x4xi1> to vector<32x4xi32>
    %42 = arith.sitofp %41 : vector<32x4xi32> to vector<32x4xf32>
    %cst_32 = arith.constant dense<0.000000e+00> : vector<32x32xf32>
    %43 = tpu.matmul %42, %36, %cst_32 {dimension_numbers = #tpu.dot_dimension_numbers<[1], [0], [0], [1], [0, 0, 1, 1], [], []>} : vector<32x4xf32>, vector<4x32xf32>, vector<32x32xf32> -> vector<32x32xf32>
    %c4_i32 = arith.constant 4 : i32
    %44 = vector.broadcast %c4_i32 : i32 to vector<32x1xi32>
    %45 = arith.cmpi sge, %37, %44 : vector<32x1xi32>
    %46 = arith.extui %45 : vector<32x1xi1> to vector<32x1xi32>
    %47 = arith.sitofp %46 : vector<32x1xi32> to vector<32x1xf32>
    %48 = vector.broadcast %47 : vector<32x1xf32> to vector<32x32xf32>
    %49 = arith.mulf %7, %48 : vector<32x32xf32>
    %50 = arith.addf %43, %49 : vector<32x32xf32>
    %c0_33 = arith.constant 0 : index
    %c0_34 = arith.constant 0 : index
    %51 = vector.load %arg14[%c0_33, %c0_34] : memref<32x32xf32, #tpu.memory_space<vmem>>, vector<32x32xf32>
    %cst_35 = arith.constant dense<0.000000e+00> : vector<32x32xf32>
    %52 = tpu.matmul %50, %51, %cst_35 {dimension_numbers = #tpu.dot_dimension_numbers<[1], [0], [0], [1], [0, 0, 1, 1], [], []>} : vector<32x32xf32>, vector<32x32xf32>, vector<32x32xf32> -> vector<32x32xf32>
    %c0_36 = arith.constant 0 : index
    %c0_37 = arith.constant 0 : index
    %53 = vector.load %arg15[%c0_36, %c0_37] : memref<1x32xf32, #tpu.memory_space<vmem>>, vector<1x32xf32>
    %54 = vector.broadcast %53 : vector<1x32xf32> to vector<32x32xf32>
    %55 = arith.addf %52, %54 : vector<32x32xf32>
    %cst_38 = arith.constant 0.000000e+00 : f32
    %56 = vector.broadcast %cst_38 : f32 to vector<32x32xf32>
    %57 = arith.maximumf %55, %56 : vector<32x32xf32>
    %c0_39 = arith.constant 0 : index
    %c0_40 = arith.constant 0 : index
    %58 = vector.load %arg16[%c0_39, %c0_40] : memref<32x128xf32, #tpu.memory_space<vmem>>, vector<32x128xf32>
    %cst_41 = arith.constant dense<0.000000e+00> : vector<32x128xf32>
    %59 = tpu.matmul %57, %58, %cst_41 {dimension_numbers = #tpu.dot_dimension_numbers<[1], [0], [0], [1], [0, 0, 1, 1], [], []>} : vector<32x32xf32>, vector<32x128xf32>, vector<32x128xf32> -> vector<32x128xf32>
    %c0_42 = arith.constant 0 : index
    %c0_43 = arith.constant 0 : index
    %60 = vector.load %arg17[%c0_42, %c0_43] : memref<1x128xf32, #tpu.memory_space<vmem>>, vector<1x128xf32>
    %61 = vector.broadcast %60 : vector<1x128xf32> to vector<32x128xf32>
    %62 = arith.addf %59, %61 : vector<32x128xf32>
    %c0_44 = arith.constant 0 : index
    %c0_45 = arith.constant 0 : index
    %63 = vector.load %arg18[%c0_44, %c0_45] : memref<32x128xf32, #tpu.memory_space<vmem>>, vector<32x128xf32>
    tpu.vector_store %arg18[%c0_44, %c0_45], %62 {strides = array<i32>} : memref<32x128xf32, #tpu.memory_space<vmem>>, vector<32x128xf32>,
    return
  }
  func.func @transform_0(%arg0: i32) -> (i32, i32) {
    %c0_i32 = arith.constant 0 : i32
    %c0_i32_0 = arith.constant 0 : i32
    %c0_i32_1 = arith.constant 0 : i32
    return %c0_i32, %c0_i32_0 : i32, i32
  }
  func.func @transform_1(%arg0: i32) -> (i32, i32) {
    %c0_i32 = arith.constant 0 : i32
    %c0_i32_0 = arith.constant 0 : i32
    %c0_i32_1 = arith.constant 0 : i32
    return %c0_i32, %c0_i32_0 : i32, i32
  }
  func.func @transform_2(%arg0: i32) -> (i32, i32) {
    %c0_i32 = arith.constant 0 : i32
    %c0_i32_0 = arith.constant 0 : i32
    %c0_i32_1 = arith.constant 0 : i32
    return %c0_i32, %c0_i32_0 : i32, i32
  }
  func.func @transform_3(%arg0: i32) -> (i32, i32) {
    %c0_i32 = arith.constant 0 : i32
    %c0_i32_0 = arith.constant 0 : i32
    %c0_i32_1 = arith.constant 0 : i32
    return %c0_i32, %c0_i32_0 : i32, i32
  }
  func.func @transform_4(%arg0: i32) -> (i32, i32) {
    %c0_i32 = arith.constant 0 : i32
    %c0_i32_0 = arith.constant 0 : i32
    %c0_i32_1 = arith.constant 0 : i32
    return %c0_i32, %c0_i32_0 : i32, i32
  }
  func.func @transform_5(%arg0: i32) -> (i32, i32) {
    %c0_i32 = arith.constant 0 : i32
    %c0_i32_0 = arith.constant 0 : i32
    %c0_i32_1 = arith.constant 0 : i32
    return %c0_i32, %c0_i32_0 : i32, i32
  }
  func.func @transform_6(%arg0: i32) -> (i32, i32) {
    %c0_i32 = arith.constant 0 : i32
    %c0_i32_0 = arith.constant 0 : i32
    %c0_i32_1 = arith.constant 0 : i32
    return %c0_i32, %c0_i32_0 : i32, i32
  }
  func.func @transform_7(%arg0: i32) -> (i32, i32) {
    %c0_i32 = arith.constant 0 : i32
    %c0_i32_0 = arith.constant 0 : i32
    %c0_i32_1 = arith.constant 0 : i32
    return %c0_i32, %c0_i32_0 : i32, i32
  }
  func.func @transform_8(%arg0: i32) -> (i32, i32) {
    %c0_i32 = arith.constant 0 : i32
    %c0_i32_0 = arith.constant 0 : i32
    %c0_i32_1 = arith.constant 0 : i32
    return %c0_i32, %c0_i32_0 : i32, i32
  }
  func.func @transform_9(%arg0: i32) -> (i32, i32) {
    %c0_i32 = arith.constant 0 : i32
    %c0_i32_0 = arith.constant 0 : i32
    %c0_i32_1 = arith.constant 0 : i32
    return %c0_i32, %c0_i32_0 : i32, i32
  }
  func.func @transform_10(%arg0: i32) -> (i32, i32) {
    %c0_i32 = arith.constant 0 : i32
    %c0_i32_0 = arith.constant 0 : i32
    %c0_i32_1 = arith.constant 0 : i32
    return %c0_i32, %c0_i32_0 : i32, i32
  }
  func.func @transform_11(%arg0: i32) -> (i32, i32) {
    %c0_i32 = arith.constant 0 : i32
    %c0_i32_0 = arith.constant 0 : i32
    %c0_i32_1 = arith.constant 0 : i32
    return %c0_i32, %c0_i32_0 : i32, i32
  }
  func.func @transform_12(%arg0: i32) -> (i32, i32) {
    %c0_i32 = arith.constant 0 : i32
    %c0_i32_0 = arith.constant 0 : i32
    %c0_i32_1 = arith.constant 0 : i32
    return %c0_i32, %c0_i32_0 : i32, i32
  }
  func.func @transform_13(%arg0: i32) -> (i32, i32) {
    %c0_i32 = arith.constant 0 : i32
    %c0_i32_0 = arith.constant 0 : i32
    %c0_i32_1 = arith.constant 0 : i32
    return %c0_i32, %c0_i32_0 : i32, i32
  }
  func.func @transform_14(%arg0: i32) -> (i32, i32) {
    %c0_i32 = arith.constant 0 : i32
    %c0_i32_0 = arith.constant 0 : i32
    %c0_i32_1 = arith.constant 0 : i32
    return %c0_i32, %c0_i32_0 : i32, i32
  }
  func.func @transform_15(%arg0: i32) -> (i32, i32) {
    %c0_i32 = arith.constant 0 : i32
    %c0_i32_0 = arith.constant 0 : i32
    %c0_i32_1 = arith.constant 0 : i32
    return %c0_i32, %c0_i32_0 : i32, i32
  }
  func.func @transform_16(%arg0: i32) -> (i32, i32) {
    %c0_i32 = arith.constant 0 : i32
    %c0_i32_0 = arith.constant 0 : i32
    %c0_i32_1 = arith.constant 0 : i32
    return %c0_i32, %c0_i32_0 : i32, i32
  }
  func.func @transform_17(%arg0: i32) -> (i32, i32) {
    %c0_i32 = arith.constant 0 : i32
    %c0_i32_0 = arith.constant 0 : i32
    %c0_i32_1 = arith.constant 0 : i32
    return %c0_i32, %c0_i32_0 : i32, i32
  }
}

</mosaic_0001>

<bundles_post_ra>
// kernel: prompt_shared_forward.1
= control target key start
LH: loop header
LB: loop body
LE: loop exit
PB: predicated region body
PF: predicated region fallthrough
CT: control target
= control target key end

     0   :  { %s1059_s0 = inlined_call_operand.vmem [shape: s32[32,1], index: 0, kind: input, shape index: {}]   ;;  %s1060_s1 = inlined_call_operand.vmem [shape: s32[32,1], index: 1, kind: input, shape index: {}]   ;;  %s1061_s2 = inlined_call_operand.vmem [shape: f32[64,32], index: 2, kind: input, shape index: {}]   ;;  %s1062_s3 = inlined_call_operand.vmem [shape: f32[4,32], index: 3, kind: input, shape index: {}]   ;;  %s1063_s4 = inlined_call_operand.vmem [shape: f32[32,32], index: 4, kind: input, shape index: {}]   ;;  %s1064_s5 = inlined_call_operand.hbm [shape: f32[1,32], index: 5, kind: input, shape index: {}]   ;;  %s1065_s6 = inlined_call_operand.vmem [shape: f32[32,32], index: 6, kind: input, shape index: {}]   ;;  %s1066_s7 = inlined_call_operand.hbm [shape: f32[1,32], index: 7, kind: input, shape index: {}]   ;;  %s1067_s8 = inlined_call_operand.vmem [shape: f32[4,32], index: 8, kind: input, shape index: {}]   ;;  %s1068_s9 = inlined_call_operand.vmem [shape: f32[32,32], index: 9, kind: input, shape index: {}]   ;;  %s1069_s10 = inlined_call_operand.vmem [shape: f32[1,32], index: 10, kind: input, shape index: {}]   ;;  %s1070_s11 = inlined_call_operand.vmem [shape: f32[32,32], index: 11, kind: input, shape index: {}]   ;;  %s1071_s12 = inlined_call_operand.vmem [shape: f32[1,32], index: 12, kind: input, shape index: {}]   ;;  %s1072_s13 = inlined_call_operand.vmem [shape: f32[32,32], index: 13, kind: input, shape index: {}]   ;;  %s1073_s14 = inlined_call_operand.hbm [shape: f32[1,32], index: 14, kind: input, shape index: {}]   ;;  %s1074_s15 = inlined_call_operand.hbm [shape: f32[32,128], index: 15, kind: input, shape index: {}]   ;;  %s1075_s16 = inlined_call_operand.hbm [shape: f32[1,128], index: 16, kind: input, shape index: {}]   ;;  %s1076_s17 = inlined_call_operand.hbm [shape: f32[32,128], index: 17, kind: output, shape index: {}]  }
   0x1   :  { %1079 = sst [smem:[#allocation16_spill]] %s1059_s0 }
   0x2   :  { %1080 = sst [smem:[#allocation17_spill]] %s1060_s1 }
   0x3   :  { %22 = vsyncpa [#allocation3], 0 }
   0x4   :  { %23 = vsyncpa [#allocation6], 0 }
   0x5   :  { %24 = vsyncpa [#allocation9], 0  ;;  %s54_s26 = sshll.u32 %s1066_s7, 4  ;;  %s55_s26 = int_to_ptr.hbm [resolvable:$true] %s54_s26 }
   0x6   :  { %25 = vsyncpa [#allocation4], 0  ;;  %s779_s27 = smov [#allocation5]   ;;  %s87_s30 = sshll.u32 %s1074_s15, 4  ;;  %s88_s30 = int_to_ptr.hbm [resolvable:$true] %s87_s30 }
   0x7   :  { %s56_s28 = sshll.u32 %s779_s27, 4  ;;  %s780_s18 = smov [#allocation8]   ;;  %s57_s28 = int_to_ptr.vmem [resolvable:$true] %s56_s28 }
   0x8   :  { %59 = dma.hbm_to_vmem [thread:$0]  %s55_s26, 16, %s57_s28, [#allocation6]  }
   0x9   :  { %s89_s19 = sshll.u32 %s780_s18, 4  ;;  %s781_s1 = smov 128   ;;  %s90_s19 = int_to_ptr.vmem [resolvable:$true] %s89_s19 }
   0xa   :  { %s782_s20 = smov 8   ;;  %s41_s22 = sshll.u32 %s1064_s5, 4  ;;  %s42_s22 = int_to_ptr.hbm [resolvable:$true] %s41_s22 }
   0xb   :  { %95 = dma.hbm_to_vmem [thread:$0]  %s88_s30, 512, %s90_s19, [#allocation9], %s781_s1, %s781_s1, %s782_s20  }
   0xc   :  { %s783_s23 = smov [#allocation2]   ;;  %s77_s26 = sshll.u32 %s1073_s14, 4  ;;  %s78_s26 = int_to_ptr.hbm [resolvable:$true] %s77_s26 }
   0xd   :  { %s43_s24 = sshll.u32 %s783_s23, 4  ;;  %s784_s27 = smov [#allocation7]   ;;  %s44_s24 = int_to_ptr.vmem [resolvable:$true] %s43_s24 }
   0xe   :  { %46 = dma.hbm_to_vmem [thread:$0]  %s42_s22, 16, %s44_s24, [#allocation3]  }
   0xf   :  { %s79_s28 = sshll.u32 %s784_s27, 4  ;;  %s101_s30 = sshll.u32 %s1075_s16, 4  ;;  %s80_s28 = int_to_ptr.vmem [resolvable:$true] %s79_s28  ;;  %s102_s30 = int_to_ptr.hbm [resolvable:$true] %s101_s30 }
  0x10   :  { %82 = dma.hbm_to_vmem [thread:$0]  %s78_s26, 16, %s80_s28, [#allocation6]  }
  0x11   :  { %s785_s5 = smov [#allocation10]  }
  0x12   :  { %s103_s18 = sshll.u32 %s785_s5, 4  ;;  %s104_s18 = int_to_ptr.vmem [resolvable:$true] %s103_s18 }
  0x13   :  { %106 = dma.hbm_to_vmem [thread:$0]  %s102_s30, 16, %s104_s18, [#allocation9]  }
  0x14   :  { %771 = dma.done.wait [#allocation3], 16  }
  0x15   :  { %772 = vsyncadd [#allocation3], 4294967280 }
  0x16   :  { %773 = dma.done.wait [#allocation6], 32  }
  0x17   :  { %774 = vsyncadd [#allocation6], 4294967264 }
  0x18   :  { %775 = dma.done.wait [#allocation9], 528  }
  0x19   :  { %776 = vsyncadd [#allocation9], 4294966768  ;;  %v786_v0 = vmov 0   ;;  %v211_v1 = vld [vmem:[%s1063_s4 + $0x18] sm:$0xff]  ;;  %v210_v3 = vld [vmem:[%s1063_s4 + $0x10] sm:$0xff]  ;;  %s1081_s0 = sld [smem:[#allocation17_spill]]  ;;  %v131_v39 = vlaneseq }
  0x1a   :  { %618 = vset.pattern.permute.xlu0 %v786_v0  ;;  %619 = vset.pattern.permute.xlu1 %v786_v0  ;;  %v276_v2 = vld [vmem:[%s1068_s9 + $0x18] sm:$0xff]  ;;  %v275_v4 = vld [vmem:[%s1068_s9 + $0x10] sm:$0xff]  ;;  %v209_v5 = vld [vmem:[%s1063_s4 + $0x8] sm:$0xff]  ;;  %vm216_vm0 = vcmask 261120   ;;  %s1082_s29 = sld [smem:[#allocation16_spill]]  ;;  %v787_v37 = vmov 0.0  }
  0x1b   :  { %620 = vset.pattern.permute.xlu2 %v786_v0  ;;  %232 = vmatpush.msra.mxu1 %v211_v1  ;;  %v274_v6 = vld [vmem:[%s1068_s9 + $0x8] sm:$0xff]  ;;  %v208_v9 = vld [vmem:[%s1063_s4] sm:$0xff]  ;;  %v164_v14 = vld [vmem:[%s1061_s2 + $0x38] sm:$0xff]  ;;  %v132_v42 = vand.u32 127, %v131_v39  ;;  %vm165_vm5 = vcmask 523264   ;;  %vm415_vm11 = vcmask 1043456  }
  0x1c   :  { %296 = vmatpush.msra.mxu3 %v276_v2  ;;  %v273_v10 = vld [vmem:[%s1068_s9] sm:$0xff]  ;;  %186 = vmatpush.msra.mxu0 %v164_v14  ;;  %v163_v15 = vld [vmem:[%s1061_s2 + $0x30] sm:$0xff]  ;;  %v244_v16 = vld [vmem:[%s1065_s6 + $0x18] sm:$0xff]  ;;  %vm402_vm12 = vcmask 31744   ;;  %s560_s5 = sshll.u32 %s1076_s17, 4  ;;  %s561_s5 = int_to_ptr.hbm [resolvable:$true] %s560_s5 }
  0x1d   :  { %233 = vmatpush.msra.mxu1 %v210_v3  ;;  %v207_v11 = vld [vmem:[%s1062_s3] sm:$0xf]  ;;  %264 = vmatpush.msra.mxu2 %v244_v16  ;;  %v162_v21 = vld [vmem:[%s1061_s2 + $0x28] sm:$0xff]  ;;  %v160_v23 = vld [vmem:[%s1061_s2 + $0x18] sm:$0xff] }
  0x1e   :  { %297 = vmatpush.msra.mxu3 %v275_v4  ;;  %v272_v12 = vld [vmem:[%s1067_s8] sm:$0xf]  ;;  %187 = vmatpush.msra.mxu0 %v163_v15  ;;  %v159_v24 = vld [vmem:[%s1061_s2 + $0x10] sm:$0xff]  ;;  %v158_v26 = vld [vmem:[%s1061_s2 + $0x8] sm:$0xff] }
  0x1f   :  { %v918_v7 = vld [vmem:[%s1081_s0] sm:$0xff]  ;;  %v923_v8 = vld [vmem:[%s1081_s0 + $0x8] sm:$0xff]  ;;  %234 = vmatpush.msra.mxu1 %v209_v5  ;;  %v340_v13 = vld [vmem:[%s1081_s0 + $0x10] sm:$0xff] }
  0x20   :  { %343 = vperm.xlu0 %618, %v918_v7   ;;  %346 = vperm.xlu1 %619, %v923_v8   ;;  %v127_v17 = vld [vmem:[%s1082_s29] sm:$0xff]  ;;  %v128_v18 = vld [vmem:[%s1082_s29 + $0x8] sm:$0xff]  ;;  %v129_v19 = vld [vmem:[%s1082_s29 + $0x10] sm:$0xff]  ;;  %vm367_vm1 = vcmp.ge.s32.totalorder %v923_v8, 4  ;;  %vm366_vm2 = vcmp.ge.s32.totalorder %v918_v7, 4  ;;  %vm368_vm3 = vcmp.ge.s32.totalorder %v340_v13, 4 }
  0x21   :  { %298 = vmatpush.msra.mxu3 %v274_v6  ;;  %349 = vperm.xlu2 %620, %v340_v13   ;;  %v130_v20 = vld [vmem:[%s1082_s29 + $0x18] sm:$0xff]  ;;  %v161_v22 = vld [vmem:[%s1061_s2 + $0x20] sm:$0xff]  ;;  %v243_v25 = vld [vmem:[%s1065_s6 + $0x10] sm:$0xff]  ;;  %v592_v38 = vsel %vm367_vm1, 1.0, %v787_v37  ;;  %v593_v40 = vsel %vm368_vm3, 1.0, %v787_v37  ;;  %v591_v41 = vsel %vm366_vm2, 1.0, %v787_v37 }
  0x22   :  { %235 = vmatpush.msra.mxu1 %v208_v9  ;;  %188 = vmatpush.msra.mxu0 %v162_v21  ;;  %v242_v27 = vld [vmem:[%s1065_s6 + $0x8] sm:$0xff]  ;;  %v157_v28 = vld [vmem:[%s1061_s2] sm:$0xff]  ;;  %v308_v30 = vld [vmem:[%s1070_s11 + $0x18] sm:$0xff] }
  0x23   :  { %299 = vmatpush.msra.mxu3 %v273_v10  ;;  %583 = vmatmul.msk.f32.vlgmr.msra.gmra.mxu1 %vm216_vm0, %v207_v11  ;;  %v241_v29 = vld [vmem:[%s1065_s6] sm:$0xff]  ;;  %v307_v31 = vld [vmem:[%s1070_s11 + $0x10] sm:$0xff]  ;;  %v306_v32 = vld [vmem:[%s1070_s11 + $0x8] sm:$0xff] }
  0x24   :  { %585 = vmatmul.msk.f32.vlgmr.msra.gmra.mxu3 %vm216_vm0, %v272_v12  ;;  %189 = vmatpush.msra.mxu0 %v161_v22  ;;  %v305_v33 = vld [vmem:[%s1070_s11] sm:$0xff]  ;;  %v341_v34 = vld [vmem:[%s1081_s0 + $0x18] sm:$0xff]  ;;  %v450_v2 = vld [vmem:[%s1072_s13 + $0x10] sm:$0xff] }
  0x25   :  { %265 = vmatpush.msra.mxu2 %v243_v25  ;;  %328 = vmatpush.msrb.mxu1 %v308_v30  ;;  %vm369_vm4 = vcmp.ge.s32.totalorder %v341_v34, 4  ;;  %v621_v48 = vld [vmem:[#allocation2] ss:$0 sm:$0xff]  ;;  %v623_v61 = vld [vmem:[#allocation5] ss:$0 sm:$0xff]  ;;  %v451_v1 = vld [vmem:[%s1072_s13 + $0x18] sm:$0xff] }
  0x26   :  { %190 = vmatpush.msra.mxu0 %v160_v23  ;;  %v594_v45 = vsel %vm369_vm4, 1.0, %v787_v37  ;;  %v622_v53 = vld [vmem:[%s1069_s10] ss:$0 sm:$0xff]  ;;  %480 = vmatpush.msrb.mxu3 %v451_v1  ;;  %v449_v12 = vld [vmem:[%s1072_s13 + $0x8] sm:$0xff] }
  0x27   :  { %266 = vmatpush.msra.mxu2 %v242_v27  ;;  %329 = vmatpush.msrb.mxu1 %v307_v31  ;;  %v624_v62 = vld [vmem:[%s1071_s12] ss:$0 sm:$0xff] }
  0x28   :  { %134 = vperm.xlu0 %618, %v127_v17   ;;  %137 = vperm.xlu1 %619, %v128_v18   ;;  %v448_v13 = vld [vmem:[%s1072_s13] sm:$0xff]  ;;  %s788_s13 = smov [#allocation11]  }
  0x29   :  { %140 = vperm.xlu2 %620, %v129_v19   ;;  %191 = vmatpush.msra.mxu0 %v159_v24  ;;  %v504_v15 = vld [vmem:[#allocation8 + $0x18] sm:$0xff]  ;;  %s558_s28 = sshll.u32 %s788_s13, 4  ;;  %s559_s28 = int_to_ptr.vmem [resolvable:$true] %s558_s28 }
  0x2a   :  { %267 = vmatpush.msra.mxu2 %v241_v29  ;;  %330 = vmatpush.msrb.mxu1 %v306_v32 }
  0x2b   :  { %192 = vmatpush.msra.mxu0 %v158_v26  ;;  %481 = vmatpush.msrb.mxu3 %v450_v2 }
  0x2c   :  { %331 = vmatpush.msrb.mxu1 %v305_v33 }
  0x2d   :  { %193 = vmatpush.msra.mxu0 %v157_v28  ;;  %482 = vmatpush.msrb.mxu3 %v449_v12 }
  0x2e   :  { %533 = vmatpush.msra.mxu1 %v504_v15 }
  0x2f   :  { %483 = vmatpush.msrb.mxu3 %v448_v13 }
  0x30   :  { %143 = vperm.xlu1 %619, %v130_v20   ;;  %352 = vperm.xlu0 %618, %v341_v34  }
  0x31   :  { %380 = vperm.xlu2 %620, %v591_v41  }
  0x38   :  { %385 = vperm.xlu0 %618, %v592_v38   ;;  %390 = vperm.xlu1 %619, %v593_v40   ;;  %v625_v38 = vld [vmem:[#allocation7] ss:$0 sm:$0xff] }
  0x39   :  { %395 = vperm.xlu2 %620, %v594_v45  }
  0x7b   :  { %v350_v44 = vpop.permute.xlu2 %349 }
  0x7c   :  { %vm356_vm14 = vcmp.eq.s32.totalorder %v350_v44, %v132_v42 }
  0x7d   :  { %v589_v9 = vsel %vm356_vm14, 1.0, %v787_v37 }
  0x83   :  { %v141_v54 = vpop.permute.xlu2 %140 }
  0x84   :  { %vm147_vm8 = vcmp.eq.s32.totalorder %v141_v54, %v132_v42 }
  0x85   :  { %v577_v58 = vsel %vm147_vm8, 1.0, %v787_v37 }
  0x8b   :  { %v381_v16 = vpop.permute.xlu2 %380 }
  0x92   :  { %v344_v35 = vpop.permute.xlu0 %343  ;;  %v347_v36 = vpop.permute.xlu1 %346 }
  0x93   :  { %vm354_vm10 = vcmp.eq.s32.totalorder %v344_v35, %v132_v42  ;;  %vm355_vm13 = vcmp.eq.s32.totalorder %v347_v36, %v132_v42  ;;  %v396_v30 = vpop.permute.xlu2 %395  ;;  %v503_v35 = vld [vmem:[#allocation8 + $0x10] sm:$0xff]  ;;  %v502_v36 = vld [vmem:[#allocation8 + $0x8] sm:$0xff] }
  0x94   :  { %v587_v7 = vsel %vm354_vm10, 1.0, %v787_v37  ;;  %v588_v8 = vsel %vm355_vm13, 1.0, %v787_v37  ;;  %534 = vmatpush.msra.mxu1 %v503_v35 }
  0x96   :  { %535 = vmatpush.msra.mxu1 %v502_v36 }
  0x9a   :  { %v135_v43 = vpop.permute.xlu0 %134  ;;  %v138_v47 = vpop.permute.xlu1 %137 }
  0x9b   :  { %vm145_vm6 = vcmp.eq.s32.totalorder %v135_v43, %v132_v42  ;;  %vm146_vm7 = vcmp.eq.s32.totalorder %v138_v47, %v132_v42 }
  0x9c   :  { %v575_v46 = vsel %vm145_vm6, 1.0, %v787_v37  ;;  %v576_v51 = vsel %vm146_vm7, 1.0, %v787_v37 }
  0x9d   :  { %579 = vmatmul.msk.f32.vlgmr.msra.gmra.mxu0 %vm165_vm5, %v575_v46 }
  0xa0   :  { %v237_v49 = vpop.f32.mrf.mxu1 }
  0xa1   :  { %v238_v50 = vadd.f32 %v621_v48, %v237_v49 }
  0xa2   :  { %v144_v59 = vpop.permute.xlu1 %143  ;;  %v353_v10 = vpop.permute.xlu0 %352 }
  0xa3   :  { %v240_v52 = vmax.f32 %v238_v50, 0.0  ;;  %vm148_vm9 = vcmp.eq.s32.totalorder %v144_v59, %v132_v42  ;;  %vm357_vm15 = vcmp.eq.s32.totalorder %v353_v10, %v132_v42 }
  0xa4   :  { %v578_v60 = vsel %vm148_vm9, 1.0, %v787_v37  ;;  %v590_v11 = vsel %vm357_vm15, 1.0, %v787_v37  ;;  %v501_v37 = vld [vmem:[#allocation8] sm:$0xff] }
  0xa5   :  { %580 = vmatmul.msk.f32.gmra.mxu0 %vm165_vm5, %v576_v51  ;;  %584 = vmatmul.msk.f32.vlgmr.msra.gmra.mxu2 %vm216_vm0, %v240_v52  ;;  %v626_v51 = vld [vmem:[#allocation10] ss:$0 sm:$0xff] }
  0xa6   :  { %536 = vmatpush.msra.mxu1 %v501_v37 }
  0xa7   :  { %v301_v55 = vpop.f32.mrf.mxu3 }
  0xa8   :  { %v302_v56 = vadd.f32 %v622_v53, %v301_v55 }
  0xaa   :  { %v304_v57 = vmax.f32 %v302_v56, 0.0  ;;  %v386_v21 = vpop.permute.xlu0 %385  ;;  %v391_v26 = vpop.permute.xlu1 %390 }
  0xac   :  { %586 = vmatmul.msk.f32.vlgmr.msrb.gmra.mxu1 %vm216_vm0, %v304_v57 }
  0xad   :  { %581 = vmatmul.msk.f32.gmra.mxu0 %vm165_vm5, %v577_v58 }
  0xb5   :  { %582 = vmatmul.msk.f32.gmra.mxu0 %vm165_vm5, %v578_v60 }
 0x11a   :  { %v195_v14 = vpop.f32.mrf.mxu0 }
 0x11b   :  { %v398_v17 = vmul.f32 %v381_v16, %v195_v14 }
 0x122   :  { %v198_v18 = vpop.f32.mrf.mxu0 }
 0x123   :  { %v399_v22 = vmul.f32 %v386_v21, %v198_v18 }
 0x128   :  { %v269_v63 = vpop.f32.mrf.mxu2 }
 0x129   :  { %v333_v0 = vpop.f32.mrf.mxu1  ;;  %v270_v3 = vadd.f32 %v623_v61, %v269_v63 }
 0x12a   :  { %v334_v4 = vadd.f32 %v624_v62, %v333_v0  ;;  %v201_v25 = vpop.f32.mrf.mxu0 }
 0x12b   :  { %v400_v27 = vmul.f32 %v391_v26, %v201_v25 }
 0x12c   :  { %v336_v5 = vadd.f32 %v334_v4, %v270_v3 }
 0x12e   :  { %v337_v6 = vmul.f32 0.5, %v336_v5 }
 0x130   :  { %595 = vmatpush.msk.msrb.mxu2 %vm415_vm11, %v337_v6 }
 0x131   :  { %596 = vmatmul.msk.f32.vlgmr.msrb.gmra.mxu2 %vm402_vm12, %v587_v7 }
 0x132   :  { %v204_v31 = vpop.f32.mrf.mxu0 }
 0x133   :  { %v401_v32 = vmul.f32 %v396_v30, %v204_v31 }
 0x139   :  { %597 = vmatmul.msk.f32.gmra.mxu2 %vm402_vm12, %v588_v8 }
 0x141   :  { %598 = vmatmul.msk.f32.gmra.mxu2 %vm402_vm12, %v589_v9 }
 0x149   :  { %599 = vmatmul.msk.f32.gmra.mxu2 %vm402_vm12, %v590_v11 }
 0x1b4   :  { %v436_v19 = vpop.f32.mrf.mxu2 }
 0x1b5   :  { %v437_v20 = vadd.f32 %v436_v19, %v398_v17 }
 0x1b7   :  { %600 = vmatmul.msk.f32.vlgmr.msrb.gmra.mxu3 %vm216_vm0, %v437_v20 }
 0x1bc   :  { %v439_v23 = vpop.f32.mrf.mxu2 }
 0x1bd   :  { %v440_v24 = vadd.f32 %v439_v23, %v399_v22 }
 0x1bf   :  { %601 = vmatmul.msk.f32.gmra.mxu3 %vm216_vm0, %v440_v24 }
 0x1c4   :  { %v442_v28 = vpop.f32.mrf.mxu2 }
 0x1c5   :  { %v443_v29 = vadd.f32 %v442_v28, %v400_v27 }
 0x1c7   :  { %602 = vmatmul.msk.f32.gmra.mxu3 %vm216_vm0, %v443_v29 }
 0x1cc   :  { %v445_v33 = vpop.f32.mrf.mxu2 }
 0x1cd   :  { %v446_v34 = vadd.f32 %v445_v33, %v401_v32 }
 0x1cf   :  { %603 = vmatmul.msk.f32.gmra.mxu3 %vm216_vm0, %v446_v34 }
 0x23a   :  { %v485_v39 = vpop.f32.mrf.mxu3 }
 0x23b   :  { %v486_v40 = vadd.f32 %v625_v38, %v485_v39 }
 0x23d   :  { %v497_v41 = vmax.f32 %v486_v40, 0.0 }
 0x23f   :  { %604 = vmatmul.msk.f32.vlgmr.msra.gmra.mxu1 %vm216_vm0, %v497_v41 }
 0x242   :  { %v488_v42 = vpop.f32.mrf.mxu3 }
 0x243   :  { %v489_v43 = vadd.f32 %v625_v38, %v488_v42 }
 0x245   :  { %v498_v44 = vmax.f32 %v489_v43, 0.0 }
 0x247   :  { %605 = vmatmul.msk.f32.gmra.mxu1 %vm216_vm0, %v498_v44 }
 0x24a   :  { %v491_v45 = vpop.f32.mrf.mxu3 }
 0x24b   :  { %v492_v46 = vadd.f32 %v625_v38, %v491_v45 }
 0x24d   :  { %v499_v47 = vmax.f32 %v492_v46, 0.0 }
 0x24f   :  { %606 = vmatmul.msk.f32.gmra.mxu1 %vm216_vm0, %v499_v47 }
 0x252   :  { %v494_v48 = vpop.f32.mrf.mxu3 }
 0x253   :  { %v495_v49 = vadd.f32 %v625_v38, %v494_v48 }
 0x255   :  { %v500_v50 = vmax.f32 %v495_v49, 0.0 }
 0x257   :  { %607 = vmatmul.msk.f32.gmra.mxu1 %vm216_vm0, %v500_v50 }
 0x2bc   :  { %v538_v52 = vpop.f32.mrf.mxu1 }
 0x2bd   :  { %v539_v53 = vadd.f32 %v626_v51, %v538_v52 }
 0x2bf   :  { %550 = vst [vmem:[#allocation11] sm:$0xff] %v539_v53 }
 0x2c4   :  { %v541_v54 = vpop.f32.mrf.mxu1 }
 0x2c5   :  { %v542_v55 = vadd.f32 %v626_v51, %v541_v54 }
 0x2c7   :  { %551 = vst [vmem:[#allocation11 + $0x8] sm:$0xff] %v542_v55 }
 0x2cc   :  { %v544_v56 = vpop.f32.mrf.mxu1 }
 0x2cd   :  { %v545_v57 = vadd.f32 %v626_v51, %v544_v56 }
 0x2cf   :  { %552 = vst [vmem:[#allocation11 + $0x10] sm:$0xff] %v545_v57 }
 0x2d4   :  { %v547_v58 = vpop.f32.mrf.mxu1 }
 0x2d5   :  { %v548_v59 = vadd.f32 %v626_v51, %v547_v58 }
 0x2d7   :  { %553 = vst [vmem:[#allocation11 + $0x18] sm:$0xff] %v548_v59 }
 0x2d8   :  { %566 = dma.vmem_to_hbm [thread:$0]  %s559_s28, 512, %s561_s5, [#allocation4], %s781_s1, %s781_s1, %s782_s20  }
 0x2d9   :  { %777 = dma.done.wait [#allocation4], 512  }
 0x2da   :  { %778 = vsyncadd [#allocation4], 4294966784 }
 0x2db   :  { %571 = vsyncpa [#allocation3], 1 }
 0x2dc   :  { %572 = vsyncpa [#allocation6], 1 }
 0x2dd   :  { %573 = vsyncpa [#allocation9], 1 }
 0x2de   :  { %574 = vsyncpa [#allocation4], 1 }

</bundles_post_ra>
